<compile_context>
chip_gen: v7x
topology: tpu7x:2x2x1
jax: 0.10.0
libtpu: 0.0.40
codegen_flags: <defaults>
</compile_context>

<pallas_src>
import math

import jax
import jax.numpy as jnp
from jax.experimental import pallas as pl
from jax.experimental.pallas import tpu as pltpu


_LANE = 128
# Sublane packing multiple per element byte-width (perf; hard layout rule is 8).
_SUBLANE = {4: 8, 2: 16, 1: 32}
# Per-block budget.  2 buffers x (in block + out block) = 4x this = 16 MiB,
# well under the 32 MiB scoped-VMEM limit we request below on every generation.
_BLOCK_BYTES = 4 * 1024 * 1024


def _copy_kernel(x_ref, o_ref):
    # Pure element copy; the squeeze itself is pure layout plumbing done by
    # the (zero-cost) wrapper-side reshapes.
    o_ref[...] = x_ref[...]


def _choose_layout(out_shape, itemsize):
    """Pick a lane-dense 2D (rows, cols) view and a row-tile size."""
    total = math.prod(out_shape) if out_shape else 1
    # Candidate column widths: trailing-contiguous extents that are multiples
    # of 128 lanes (unmasked vst, long contiguous DMA bursts).
    cands, c = [], 1
    for d in reversed(out_shape):
        c *= d
        if c % _LANE == 0:
            cands.append(c)
    if not cands:
        # Tiny / irregular trailing extent: single full-array block.
        return 1, total, 1

    fitting = [w for w in cands if w * itemsize <= _BLOCK_BYTES]
    cols = max(fitting) if fitting else min(cands)
    rows = total // cols

    pack = _SUBLANE.get(itemsize, 8)
    max_rows = max(1, _BLOCK_BYTES // (cols * itemsize))
    tile_rows = rows  # full extent: always layout-legal fallback
    for align in (pack, 8):
        found = None
        for t in range(min(rows, max_rows), 0, -1):
            if rows % t == 0 and (t % align == 0 or t == rows):
                found = t
                break
        if found is not None:
            tile_rows = found
            break
    return rows, cols, tile_rows


def pallas_squeeze(x, axis, *, materialize=False):
    """Equivalent of torch.squeeze(x, axis).

    Default path is metadata-only (free): removing a size-1 axis of a
    contiguous array never moves data.  `materialize=True` performs the copy
    with a Pallas kernel using a lane-dense 2D tiling.
    """
    ndim = x.ndim
    ax = axis % ndim
    # torch.squeeze(x, dim) is a no-op (returns x unchanged) if dim size != 1.
    if x.shape[ax] != 1:
        return x
    out_shape = x.shape[:ax] + x.shape[ax + 1:]

    if not materialize:
        # Biggest win per the perf review: zero HBM traffic, zero kernel launch.
        return jax.lax.squeeze(x, (ax,))

    itemsize = jnp.dtype(x.dtype).itemsize
    rows, cols, tile_rows = _choose_layout(out_shape, itemsize)

    # Removing a size-1 axis preserves linear element order, so the very same
    # lane-dense (rows, cols) view describes both input and output.  These
    # reshapes are wrapper-side layout plumbing (metadata only); the kernel is
    # the only data movement.
    x2d = x.reshape(rows, cols)
    grid = (rows // tile_rows,)

    out2d = pl.pallas_call(
        _copy_kernel,
        out_shape=jax.ShapeDtypeStruct((rows, cols), x.dtype),
        grid=grid,
        in_specs=[pl.BlockSpec((tile_rows, cols), lambda i: (i, 0))],
        out_specs=pl.BlockSpec((tile_rows, cols), lambda i: (i, 0)),
        compiler_params=pltpu.CompilerParams(
            # One parallel row-tile axis: v7x's two TensorCores split the copy;
            # harmless no-op on single-core v5e/v6e.
            dimension_semantics=("parallel",),
            # Double-buffered in+out blocks need <= 16 MiB; 32 MiB is above the
            # v5e 16 MiB scoped default yet safely below physical VMEM on every
            # generation (64 MiB on v7x).
            vmem_limit_bytes=32 * 1024 * 1024,
        ),
    )(x2d)
    return out2d.reshape(out_shape)


if __name__ == "__main__":
    key = jax.random.PRNGKey(0)
    # NCHW-style input with an extra size-1 axis at position 1.
    x = jax.random.normal(key, (2, 1, 4, 16, 16), dtype=jnp.float32)
    axis = 1
    ref = jnp.squeeze(x, axis=axis)

    # Fast (default) path: metadata-only squeeze -- no kernel, no HBM traffic.
    out_fast = jax.block_until_ready(pallas_squeeze(x, axis))
    assert out_fast.shape == ref.shape == (2, 4, 16, 16)
    assert out_fast.dtype == ref.dtype
    assert bool(jnp.array_equal(out_fast, ref))

    # Materializing Pallas copy path (lane-dense 2D tiling), run once.
    out_kernel = jax.block_until_ready(pallas_squeeze(x, axis, materialize=True))
    assert out_kernel.shape == ref.shape
    assert out_kernel.dtype == ref.dtype
    assert bool(jnp.array_equal(out_kernel, ref))

    print("KERNEL_OK")
</pallas_src>

<mosaic_0001>
module attributes {stable_mosaic.version = 11 : i64} {
  func.func @_copy_kernel(%arg0: i32, %arg1: memref<1x2048xf32, #tpu.memory_space<vmem>>, %arg2: memref<1x2048xf32, #tpu.memory_space<vmem>>) attributes {dimension_semantics = [#tpu.dimension_semantics<parallel>], iteration_bounds = array<i64: 1>, scalar_prefetch = 0 : i64, scratch_operands = 0 : i64, tpu.core_type = #tpu.core_type<tc>, window_params = [{transform_indices = @transform_0, window_bounds = array<i64: 1, 2048>}, {transform_indices = @transform_1, window_bounds = array<i64: 1, 2048>}]} {
    %c0 = arith.constant 0 : index
    %c0_0 = arith.constant 0 : index
    %0 = vector.load %arg1[%c0, %c0_0] : memref<1x2048xf32, #tpu.memory_space<vmem>>, vector<1x2048xf32>
    %c0_1 = arith.constant 0 : index
    %c0_2 = arith.constant 0 : index
    %1 = vector.load %arg2[%c0_1, %c0_2] : memref<1x2048xf32, #tpu.memory_space<vmem>>, vector<1x2048xf32>
    tpu.vector_store %arg2[%c0_1, %c0_2], %0 {strides = array<i32>} : memref<1x2048xf32, #tpu.memory_space<vmem>>, vector<1x2048xf32>,
    return
  }
  func.func @transform_0(%arg0: i32) -> (i32, i32) {
    %c0_i32 = arith.constant 0 : i32
    %c0_i32_0 = arith.constant 0 : i32
    return %arg0, %c0_i32 : i32, i32
  }
  func.func @transform_1(%arg0: i32) -> (i32, i32) {
    %c0_i32 = arith.constant 0 : i32
    %c0_i32_0 = arith.constant 0 : i32
    return %arg0, %c0_i32 : i32, i32
  }
}

</mosaic_0001>

<bundles_post_ra>
// kernel: tpu_custom_call.1
= control target key start
LH: loop header
LB: loop body
LE: loop exit
PB: predicated region body
PF: predicated region fallthrough
CT: control target
= control target key end

     0   :  { %6 = vsyncpa [#allocation3], 0  ;;  %s126_s0 = inlined_call_operand.hbm [shape: f32[1,2048], index: 0, kind: input, shape index: {}]   ;;  %s127_s1 = inlined_call_operand.hbm [shape: f32[1,2048], index: 1, kind: output, shape index: {}]  }
   0x1   :  { %7 = vsyncpa [#allocation4], 0  ;;  %s90_s6 = smov [#allocation2]   ;;  %s42_s10 = scalar_lea.hbm %s126_s0, 256 }
   0x2   :  { %s14_s7 = sshll.u32 %s90_s6, 4  ;;  %p43_p0 = scmp.ne.s32.totalorder %s126_s0, %s42_s10  ;;  %s15_s7 = int_to_ptr.vmem [resolvable:$true] %s14_s7 }
   0x3   :  { %p46_p1 = scmp.lt.u32.totalorder %s42_s10, %s126_s0 }
   0x5   :  { %p48_p2 = pnand %p46_p1, %p43_p0 }
   0x7   :  { %51 = shalt.err (!%p48_p2)
}
   0x8   :  { %s52_s15 = scalar_lea.vmem %s15_s7, 256  ;;  %p57_p4 = scmp.lt.s32.totalorder %s15_s7, %s15_s7 }
   0x9   :  { %p53_p3 = scmp.ne.s32.totalorder %s15_s7, %s52_s15  ;;  %p58_p5 = scmp.lt.s32.totalorder %s52_s15, %s52_s15 }
   0xb   :  { %p59_p6 = por %p58_p5, %p57_p4 }
   0xd   :  { %p60_p7 = pnand %p59_p6, %p53_p3 }
   0xf   :  { %63 = shalt.err (!%p60_p7)
}
  0x10   :  { %17 = dma.hbm_to_vmem [thread:$0]  %s126_s0, 256, %s15_s7, [#allocation3]  }
  0x11   :  { %86 = dma.done.wait [#allocation3], 256  }
  0x12   :  { %87 = vsyncadd [#allocation3], 4294967040  ;;  %s91_s18 = smov [#allocation5]   ;;  %v21_v0 = vld [vmem:[#allocation2] sm:$0xff]  ;;  %v22_v1 = vld [vmem:[#allocation2 + $0x8] sm:$0xff] }
  0x13   :  { %s31_s19 = sshll.u32 %s91_s18, 4  ;;  %23 = vst [vmem:[#allocation5] sm:$0xff] %v21_v0  ;;  %24 = vst [vmem:[#allocation5 + $0x8] sm:$0xff] %v22_v1  ;;  %s32_s19 = int_to_ptr.vmem [resolvable:$true] %s31_s19 }
  0x14   :  { %s64_s20 = scalar_lea.vmem %s32_s19, 256  ;;  %p69_p9 = scmp.lt.s32.totalorder %s32_s19, %s32_s19 }
  0x15   :  { %p65_p8 = scmp.ne.s32.totalorder %s32_s19, %s64_s20  ;;  %p70_p10 = scmp.lt.s32.totalorder %s64_s20, %s64_s20 }
  0x17   :  { %p71_p11 = por %p70_p10, %p69_p9 }
  0x19   :  { %p72_p12 = pnand %p71_p11, %p65_p8 }
  0x1b   :  { %75 = shalt.err (!%p72_p12)
}
  0x1c   :  { %s76_s0 = scalar_lea.hbm %s127_s1, 256 }
  0x1d   :  { %p77_p13 = scmp.ne.s32.totalorder %s127_s1, %s76_s0  ;;  %p80_p0 = scmp.lt.u32.totalorder %s76_s0, %s127_s1 }
  0x1f   :  { %p82_p1 = pnand %p80_p0, %p77_p13 }
  0x21   :  { %85 = shalt.err (!%p82_p1)
}
  0x22   :  { %34 = dma.vmem_to_hbm [thread:$0]  %s32_s19, 256, %s127_s1, [#allocation4]  }
  0x23   :  { %88 = dma.done.wait [#allocation4], 256  }
  0x24   :  { %89 = vsyncadd [#allocation4], 4294967040 }
  0x25   :  { %38 = vsyncpa [#allocation3], 1 }
  0x26   :  { %39 = vsyncpa [#allocation4], 1 }

</bundles_post_ra>
